<compile_context>
chip_gen: v7x
topology: tpu7x:2x2x1
jax: 0.10.0
libtpu: 0.0.40
codegen_flags: <defaults>
</compile_context>

<pallas_src>
import functools

import jax
import jax.numpy as jnp
from jax import lax
from jax.experimental import pallas as pl
from jax.experimental.pallas import tpu as pltpu


def _add_pos_dropout_kernel(x_ref, pos_ref, o_ref, *,
                            dropout_rate, seed, block_batch, num_patches, dim):
    """One grid step == `block_batch` batch rows.

    x_ref  : (TB, N, D) VMEM tile of the input
    pos_ref: (1,  N, D) VMEM tile of the positional embedding (constant
             index_map, so Pallas does not re-DMA it per step)
    o_ref  : (TB, N, D) VMEM output tile (aliases x's HBM buffer)
    """
    y = x_ref[...] + pos_ref[...]          # (TB,N,D) + (1,N,D) broadcast add

    if dropout_rate > 0.0:
        shape = y.shape
        # Global element index -> counter-based hash -> random bits.  Order-
        # independent (safe with "parallel" grid semantics) and portable
        # (no TPU-only PRNG primitive).
        bi = lax.broadcasted_iota(jnp.int32, shape, 0)
        ni = lax.broadcasted_iota(jnp.int32, shape, 1)
        di = lax.broadcasted_iota(jnp.int32, shape, 2)
        b0 = pl.program_id(0) * block_batch
        lin = (b0 + bi) * (num_patches * dim) + ni * dim + di

        seed_mix = (int(seed) * 0x9E3779B9) & 0xFFFFFFFF
        z = lin.astype(jnp.uint32) + jnp.uint32(seed_mix)
        # lowbias32 finalizer: good avalanche on sequential counters.
        z = z ^ (z >> 16)
        z = z * jnp.uint32(0x7FEB352D)
        z = z ^ (z >> 15)
        z = z * jnp.uint32(0x846CA68B)
        z = z ^ (z >> 16)

        # Integer threshold compare on the low 24 bits (no int->f32 convert).
        threshold = int(round(dropout_rate * (1 << 24)))
        keep = (z & jnp.uint32(0x00FFFFFF)) >= jnp.uint32(threshold)
        scale = jnp.float32(1.0 / (1.0 - dropout_rate))
        y = jnp.where(keep, y * scale, jnp.zeros_like(y))

    o_ref[...] = y.astype(o_ref.dtype)


def _pick_block_batch(B, N, D, itemsize, target_bytes=1 << 20):
    """Batch rows per block so one x tile is ~1 MiB.

    VMEM per step ~= 2*(x tile) + 2*(out tile) + pos tile (double-buffered),
    i.e. ~4-5 MiB at the 1 MiB target -- well inside the scoped VMEM limit on
    v5e/v6e (128 MiB physical) and v7x (64 MiB physical).
    """
    per_row = N * D * itemsize
    return int(max(1, min(B, target_bytes // max(per_row, 1))))


def absolute_position_embeddings(x, pos_embedding, *, dropout_rate=0.1,
                                 seed=0, train=True):
    """x: (B, N, D).  pos_embedding: (1, N, D).  Same semantics as the torch
    module's forward (add learnable position embedding, then dropout)."""
    B, N, D = x.shape
    assert pos_embedding.shape == (1, N, D)
    assert 0.0 <= float(dropout_rate) < 1.0

    if not train:
        # Inference: dropout is the identity.  Plain JAX add fuses into
        # neighboring ops; a standalone kernel would only add HBM traffic.
        return x + pos_embedding

    TB = _pick_block_batch(B, N, D, jnp.dtype(x.dtype).itemsize)
    grid = (pl.cdiv(B, TB),)

    kernel = functools.partial(
        _add_pos_dropout_kernel,
        dropout_rate=float(dropout_rate), seed=int(seed),
        block_batch=TB, num_patches=N, dim=D)

    return pl.pallas_call(
        kernel,
        out_shape=jax.ShapeDtypeStruct((B, N, D), x.dtype),
        grid=grid,
        in_specs=[
            pl.BlockSpec((TB, N, D), lambda b: (b, 0, 0)),   # x
            pl.BlockSpec((1, N, D), lambda b: (0, 0, 0)),    # pos (shared)
        ],
        out_specs=pl.BlockSpec((TB, N, D), lambda b: (b, 0, 0)),
        # Semantically in-place (x = dropout(x + pos)): alias x -> out.
        input_output_aliases={0: 0},
        compiler_params=pltpu.CompilerParams(
            dimension_semantics=("parallel",)),
    )(x, pos_embedding)


if __name__ == "__main__":
    # Small shapes consistent with the module: batch=2, num_patches=8, dim=128.
    B, N, D = 2, 8, 128
    dropout_rate = 0.1

    key = jax.random.PRNGKey(0)
    kx, kp = jax.random.split(key)
    x = jax.random.normal(kx, (B, N, D), dtype=jnp.float32)
    # Deterministic init of the learnable parameter (torch.randn equivalent).
    pos_embedding = jax.random.normal(kp, (1, N, D), dtype=jnp.float32)

    ref = x + pos_embedding

    # Training-mode forward (add + dropout) through the Pallas kernel.
    out_train = absolute_position_embeddings(
        x, pos_embedding, dropout_rate=dropout_rate, seed=123, train=True)
    out_train = jax.block_until_ready(out_train)

    # Kernel path with dropout disabled (rate=0, still through the kernel):
    # must equal the plain broadcast add exactly.
    out_id = absolute_position_embeddings(
        x, pos_embedding, dropout_rate=0.0, seed=0, train=True)
    out_id = jax.block_until_ready(out_id)
    assert jnp.allclose(out_id, ref, atol=1e-6), "kernel add path mismatch"

    # Eval-mode forward (plain JAX fast path; dropout is identity).
    out_eval = absolute_position_embeddings(
        x, pos_embedding, dropout_rate=dropout_rate, train=False)
    out_eval = jax.block_until_ready(out_eval)
    assert jnp.allclose(out_eval, ref, atol=1e-6), "eval-mode mismatch"

    # Dropout sanity: kept entries equal (x+pos)/(1-p), dropped entries are
    # exactly zero, and the drop fraction is roughly p.
    scaled_ref = ref / (1.0 - dropout_rate)
    dropped = out_train == 0.0
    kept_ok = jnp.allclose(jnp.where(dropped, 0.0, out_train),
                           jnp.where(dropped, 0.0, scaled_ref),
                           atol=1e-5)
    assert bool(kept_ok), "kept entries of dropout output mismatch"
    drop_frac = float(jnp.mean(dropped.astype(jnp.float32)))
    assert 0.0 < drop_frac < 0.3, f"unexpected drop fraction {drop_frac}"

    print("KERNEL_OK")
</pallas_src>

<mosaic_0001>
module attributes {stable_mosaic.version = 11 : i64} {
  func.func @_add_pos_dropout_kernel(%arg0: i32, %arg1: memref<2x8x128xf32, #tpu.memory_space<vmem>>, %arg2: memref<1x8x128xf32, #tpu.memory_space<vmem>>, %arg3: memref<2x8x128xf32, #tpu.memory_space<vmem>>) attributes {dimension_semantics = [#tpu.dimension_semantics<parallel>], iteration_bounds = array<i64: 1>, scalar_prefetch = 0 : i64, scratch_operands = 0 : i64, tpu.core_type = #tpu.core_type<tc>, window_params = [{transform_indices = @transform_0, window_bounds = array<i64: 2, 8, 128>}, {pipeline_mode = #tpu.pipeline_mode<synchronous>, transform_indices = @transform_1, window_bounds = array<i64: 1, 8, 128>}, {transform_indices = @transform_2, window_bounds = array<i64: 2, 8, 128>}]} {
    %c0 = arith.constant 0 : index
    %c0_0 = arith.constant 0 : index
    %c0_1 = arith.constant 0 : index
    %0 = vector.load %arg1[%c0, %c0_0, %c0_1] : memref<2x8x128xf32, #tpu.memory_space<vmem>>, vector<2x8x128xf32>
    %c0_2 = arith.constant 0 : index
    %c0_3 = arith.constant 0 : index
    %c0_4 = arith.constant 0 : index
    %1 = vector.load %arg2[%c0_2, %c0_3, %c0_4] : memref<1x8x128xf32, #tpu.memory_space<vmem>>, vector<1x8x128xf32>
    %2 = vector.broadcast %1 : vector<1x8x128xf32> to vector<2x8x128xf32>
    %3 = arith.addf %0, %2 : vector<2x8x128xf32>
    %4 = tpu.iota {dimensions = array<i32: 0>} : vector<2x8x128xi32>
    %5 = tpu.iota {dimensions = array<i32: 1>} : vector<2x8x128xi32>
    %6 = tpu.iota {dimensions = array<i32: 2>} : vector<2x8x128xi32>
    %c2_i32 = arith.constant 2 : i32
    %7 = arith.muli %arg0, %c2_i32 : i32
    %8 = vector.broadcast %7 : i32 to vector<2x8x128xi32>
    %9 = arith.addi %8, %4 : vector<2x8x128xi32>
    %c1024_i32 = arith.constant 1024 : i32
    %10 = vector.broadcast %c1024_i32 : i32 to vector<2x8x128xi32>
    %11 = arith.muli %9, %10 : vector<2x8x128xi32>
    %c128_i32 = arith.constant 128 : i32
    %12 = vector.broadcast %c128_i32 : i32 to vector<2x8x128xi32>
    %13 = arith.muli %5, %12 : vector<2x8x128xi32>
    %14 = arith.addi %11, %13 : vector<2x8x128xi32>
    %15 = arith.addi %14, %6 : vector<2x8x128xi32>
    %c78085091_i32 = arith.constant 78085091 : i32
    %16 = vector.broadcast %c78085091_i32 : i32 to vector<2x8x128xi32>
    %17 = arith.addi %15, %16 : vector<2x8x128xi32>
    %c16_i32 = arith.constant 16 : i32
    %18 = vector.broadcast %c16_i32 : i32 to vector<2x8x128xi32>
    %19 = arith.shrui %17, %18 : vector<2x8x128xi32>
    %20 = arith.xori %17, %19 : vector<2x8x128xi32>
    %c2146121005_i32 = arith.constant 2146121005 : i32
    %21 = vector.broadcast %c2146121005_i32 : i32 to vector<2x8x128xi32>
    %22 = arith.muli %20, %21 : vector<2x8x128xi32>
    %c15_i32 = arith.constant 15 : i32
    %23 = vector.broadcast %c15_i32 : i32 to vector<2x8x128xi32>
    %24 = arith.shrui %22, %23 : vector<2x8x128xi32>
    %25 = arith.xori %22, %24 : vector<2x8x128xi32>
    %c-2073254261_i32 = arith.constant -2073254261 : i32
    %26 = vector.broadcast %c-2073254261_i32 : i32 to vector<2x8x128xi32>
    %27 = arith.muli %25, %26 : vector<2x8x128xi32>
    %c16_i32_5 = arith.constant 16 : i32
    %28 = vector.broadcast %c16_i32_5 : i32 to vector<2x8x128xi32>
    %29 = arith.shrui %27, %28 : vector<2x8x128xi32>
    %30 = arith.xori %27, %29 : vector<2x8x128xi32>
    %c16777215_i32 = arith.constant 16777215 : i32
    %31 = vector.broadcast %c16777215_i32 : i32 to vector<2x8x128xi32>
    %32 = arith.andi %30, %31 : vector<2x8x128xi32>
    %c1677722_i32 = arith.constant 1677722 : i32
    %33 = vector.broadcast %c1677722_i32 : i32 to vector<2x8x128xi32>
    %34 = arith.cmpi uge, %32, %33 : vector<2x8x128xi32>
    %cst = arith.constant 1.11111116 : f32
    %35 = vector.broadcast %cst : f32 to vector<2x8x128xf32>
    %36 = arith.mulf %3, %35 : vector<2x8x128xf32>
    %cst_6 = arith.constant 0.000000e+00 : f32
    %37 = vector.broadcast %cst_6 : f32 to vector<2x8x128xf32>
    %38 = arith.select %34, %36, %37 : vector<2x8x128xi1>, vector<2x8x128xf32>
    %c0_7 = arith.constant 0 : index
    %c0_8 = arith.constant 0 : index
    %c0_9 = arith.constant 0 : index
    %39 = vector.load %arg3[%c0_7, %c0_8, %c0_9] : memref<2x8x128xf32, #tpu.memory_space<vmem>>, vector<2x8x128xf32>
    tpu.vector_store %arg3[%c0_7, %c0_8, %c0_9], %38 {strides = array<i32>} : memref<2x8x128xf32, #tpu.memory_space<vmem>>, vector<2x8x128xf32>,
    return
  }
  func.func @transform_0(%arg0: i32) -> (i32, i32, i32) {
    %c0_i32 = arith.constant 0 : i32
    %c0_i32_0 = arith.constant 0 : i32
    %c0_i32_1 = arith.constant 0 : i32
    return %arg0, %c0_i32, %c0_i32_0 : i32, i32, i32
  }
  func.func @transform_1(%arg0: i32) -> (i32, i32, i32) {
    %c0_i32 = arith.constant 0 : i32
    %c0_i32_0 = arith.constant 0 : i32
    %c0_i32_1 = arith.constant 0 : i32
    %c0_i32_2 = arith.constant 0 : i32
    return %c0_i32, %c0_i32_0, %c0_i32_1 : i32, i32, i32
  }
  func.func @transform_2(%arg0: i32) -> (i32, i32, i32) {
    %c0_i32 = arith.constant 0 : i32
    %c0_i32_0 = arith.constant 0 : i32
    %c0_i32_1 = arith.constant 0 : i32
    return %arg0, %c0_i32, %c0_i32_0 : i32, i32, i32
  }
}

</mosaic_0001>

<bundles_post_ra>
// kernel: tpu_custom_call.1
= control target key start
LH: loop header
LB: loop body
LE: loop exit
PB: predicated region body
PF: predicated region fallthrough
CT: control target
= control target key end

     0   :  { %7 = vsyncpa [#allocation3], 0  ;;  %s194_s0 = inlined_call_operand.hbm [shape: f32[2,8,128], index: 0, kind: input, shape index: {}, may-alias: {0,2}]   ;;  %s195_s1 = inlined_call_operand.vmem [shape: f32[1,8,128], index: 1, kind: input, shape index: {}]   ;;  %s196_s2 = inlined_call_operand.hbm [shape: f32[2,8,128], index: 2, kind: output, shape index: {}, may-alias: {0,2}]  }
   0x1   :  { %8 = vsyncpa [#allocation4], 0  ;;  %s142_s9 = smov [#allocation2]   ;;  %s94_s13 = scalar_lea.hbm %s194_s0, 256 }
   0x2   :  { %s14_s10 = sshll.u32 %s142_s9, 4  ;;  %p95_p0 = scmp.ne.s32.totalorder %s194_s0, %s94_s13  ;;  %s15_s10 = int_to_ptr.vmem [resolvable:$true] %s14_s10 }
   0x3   :  { %p98_p1 = scmp.lt.u32.totalorder %s94_s13, %s194_s0 }
   0x5   :  { %p100_p2 = pnand %p98_p1, %p95_p0 }
   0x7   :  { %103 = shalt.err (!%p100_p2)
}
   0x8   :  { %s104_s18 = scalar_lea.vmem %s15_s10, 256  ;;  %p109_p4 = scmp.lt.s32.totalorder %s15_s10, %s15_s10 }
   0x9   :  { %p105_p3 = scmp.ne.s32.totalorder %s15_s10, %s104_s18  ;;  %p110_p5 = scmp.lt.s32.totalorder %s104_s18, %s104_s18 }
   0xb   :  { %p111_p6 = por %p110_p5, %p109_p4 }
   0xd   :  { %p112_p7 = pnand %p111_p6, %p105_p3 }
   0xf   :  { %115 = shalt.err (!%p112_p7)
}
  0x10   :  { %s143_s19 = smov 128   ;;  %s144_s20 = smov 8  }
  0x11   :  { %20 = dma.hbm_to_vmem [thread:$0]  %s194_s0, 256, %s15_s10, [#allocation3], %s143_s19, %s143_s19, %s144_s20  }
  0x12   :  { %138 = dma.done.wait [#allocation3], 256  }
  0x13   :  { %139 = vsyncadd [#allocation3], 4294967040  ;;  %v31_v0 = vlaneseq  ;;  %v26_v16 = vld [vmem:[#allocation2] sm:$0xff]  ;;  %v27_v21 = vld [vmem:[#allocation2 + $0x8] sm:$0xff]  ;;  %s145_s24 = smov [#allocation5]  }
  0x14   :  { %v28_v17 = vld [vmem:[%s195_s1] sm:$0xff]  ;;  %s78_s25 = sshll.u32 %s145_s24, 4  ;;  %s79_s25 = int_to_ptr.vmem [resolvable:$true] %s78_s25 }
  0x15   :  { %v32_v1 = vshrl.u32 %v31_v0, 7  ;;  %v34_v2 = vand.u32 127, %v31_v0  ;;  %v29_v23 = vadd.f32 %v28_v17, %v26_v16  ;;  %v30_v26 = vadd.f32 %v28_v17, %v27_v21  ;;  %s116_s1 = scalar_lea.vmem %s79_s25, 256  ;;  %p121_p9 = scmp.lt.s32.totalorder %s79_s25, %s79_s25 }
  0x16   :  { %p117_p8 = scmp.ne.s32.totalorder %s79_s25, %s116_s1  ;;  %p122_p10 = scmp.lt.s32.totalorder %s116_s1, %s116_s1 }
  0x17   :  { %v40_v3 = vmul.u32 128, %v32_v1  ;;  %v67_v29 = vmul.f32 1.1111112, %v29_v23  ;;  %v68_v32 = vmul.f32 1.1111112, %v30_v26 }
  0x18   :  { %p123_p11 = por %p122_p10, %p121_p9 }
  0x19   :  { %v43_v4 = vadd.s32 %v40_v3, %v34_v2  ;;  %v42_v5 = vadd.s32 1024, %v40_v3 }
  0x1a   :  { %p124_p12 = pnand %p123_p11, %p117_p8 }
  0x1b   :  { %v45_v6 = vadd.s32 78085091, %v43_v4  ;;  %v44_v7 = vadd.s32 %v42_v5, %v34_v2 }
  0x1d   :  { %v47_v8 = vshrl.u32 %v45_v6, 16  ;;  %v46_v9 = vadd.s32 78085091, %v44_v7 }
  0x1f   :  { %v49_v10 = vxor.u32 %v47_v8, %v45_v6  ;;  %v48_v11 = vshrl.u32 %v46_v9, 16 }
  0x21   :  { %v51_v12 = vmul.u32 2146121005, %v49_v10  ;;  %v50_v13 = vxor.u32 %v48_v11, %v46_v9 }
  0x23   :  { %v53_v14 = vshrl.u32 %v51_v12, 15  ;;  %v52_v15 = vmul.u32 2146121005, %v50_v13 }
  0x25   :  { %v55_v18 = vxor.u32 %v53_v14, %v51_v12  ;;  %v54_v19 = vshrl.u32 %v52_v15, 15 }
  0x27   :  { %v57_v20 = vmul.u32 2221713035, %v55_v18  ;;  %v56_v22 = vxor.u32 %v54_v19, %v52_v15 }
  0x29   :  { %v59_v24 = vshrl.u32 %v57_v20, 16  ;;  %v58_v25 = vmul.u32 2221713035, %v56_v22 }
  0x2b   :  { %v61_v27 = vxor.u32 %v59_v24, %v57_v20  ;;  %v60_v28 = vshrl.u32 %v58_v25, 16 }
  0x2d   :  { %v63_v30 = vand.u32 16777215, %v61_v27  ;;  %v62_v31 = vxor.u32 %v60_v28, %v58_v25 }
  0x2f   :  { %vm65_vm0 = vcmp.ge.u32.totalorder %v63_v30, 1677722  ;;  %v64_v33 = vand.u32 16777215, %v62_v31 }
  0x30   :  { %v69_v34 = vsel %vm65_vm0, %v67_v29, 0.0 }
  0x31   :  { %71 = vst [vmem:[#allocation5] sm:$0xff] %v69_v34  ;;  %vm66_vm1 = vcmp.ge.u32.totalorder %v64_v33, 1677722 }
  0x32   :  { %v70_v35 = vsel %vm66_vm1, %v68_v32, 0.0 }
  0x33   :  { %72 = vst [vmem:[#allocation5 + $0x8] sm:$0xff] %v70_v35 }
  0x34   :  { %127 = shalt.err (!%p124_p12)
}
  0x35   :  { %s128_s28 = scalar_lea.hbm %s196_s2, 256 }
  0x36   :  { %p129_p13 = scmp.ne.s32.totalorder %s196_s2, %s128_s28  ;;  %p132_p0 = scmp.lt.u32.totalorder %s128_s28, %s196_s2 }
  0x38   :  { %p134_p1 = pnand %p132_p0, %p129_p13 }
  0x3a   :  { %137 = shalt.err (!%p134_p1)
}
  0x3b   :  { %84 = dma.vmem_to_hbm [thread:$0]  %s79_s25, 256, %s196_s2, [#allocation4], %s143_s19, %s143_s19, %s144_s20  }
  0x3c   :  { %140 = dma.done.wait [#allocation4], 256  }
  0x3d   :  { %141 = vsyncadd [#allocation4], 4294967040 }
  0x3e   :  { %88 = vsyncpa [#allocation3], 1 }
  0x3f   :  { %89 = vsyncpa [#allocation4], 1 }

</bundles_post_ra>
